<compile_context>
chip_gen: v7x
topology: tpu7x:2x2x1
jax: 0.10.0
libtpu: 0.0.40
codegen_flags: <defaults>
</compile_context>

<pallas_src>
import numpy as np
import jax
import jax.numpy as jnp
from jax.experimental import pallas as pl
from jax.experimental.pallas import tpu as pltpu


def _round_up(v, m):
    return ((v + m - 1) // m) * m


def _scale_kernel(x_ref, gm_ref, o_ref):
    # x_ref : (TB, KD)   f32 (packed) feature values for this batch tile
    # gm_ref: (KD, KDE)  f32 masked / block-diagonal base embeddings
    # o_ref : (TB, KDE)  scaled embeddings, lane-dense
    o_ref[...] = jnp.dot(
        x_ref[...], gm_ref[...],
        preferred_element_type=jnp.float32,
        precision=jax.lax.Precision.HIGHEST,
    ).astype(o_ref.dtype)


def features_embedding_scale(x, weight, offsets, embed_dim, *, tb=None,
                             out_dtype=jnp.float32):
    """x: (B, D) int; weight: (sum(field_dims), E) f32; offsets: (D,) int32.

    Returns (B, D*E): out[b, d*E+e] = x[b, d] * weight[offsets[d], e].
    """
    B, D = x.shape
    E = embed_dim
    DE = D * E

    # Tiny D-row gather of the parameter table + masking (parameter glue, D*E*4 B).
    # TODO(synk): could be fused via scalar-prefetch + pl.Element row indexing.
    ge_flat = weight[offsets].reshape(1, DE).astype(jnp.float32)        # (1, D*E)
    sel = (jnp.arange(DE, dtype=jnp.int32)[None, :] // E
           == jnp.arange(D, dtype=jnp.int32)[:, None])                  # (D, D*E)
    gm = jnp.where(sel, ge_flat, jnp.float32(0.0))                      # (D, D*E)

    # Lane-dense packing: k batch rows per output row when D*E < 128.
    k = (128 // DE) if (DE < 128 and 128 % DE == 0) else 1
    B_pad = k * pl.cdiv(B, k)
    xf = x.astype(jnp.float32)
    if B_pad != B:
        xf = jnp.pad(xf, ((0, B_pad - B), (0, 0)))          # zero rows -> zero out
    if k > 1:
        gm = jnp.kron(jnp.eye(k, dtype=jnp.float32), gm)    # (k*D, k*DE) block-diag
        xf = xf.reshape(B_pad // k, k * D)
    R, KD = xf.shape
    KDE = k * DE

    # Pad the contraction dim to a multiple of 8 sublanes (zeros are inert).
    KD_pad = _round_up(KD, 8)
    if KD_pad != KD:
        xf = jnp.pad(xf, ((0, 0), (0, KD_pad - KD)))
        gm = jnp.pad(gm, ((0, KD_pad - KD), (0, 0)))
        KD = KD_pad

    if tb is None:
        # ~6 MiB output blocks (2 buffers << 32 MiB scoped-VMEM default on all
        # generations incl. v7x); keep >= 2 grid steps so both v7x TCs get work.
        tb = max(8, min(8192, (6 << 20) // (KDE * 4)))
        tb -= tb % 8
        tb = min(tb, _round_up(pl.cdiv(R, 2), 8))
    tb = min(tb, R)   # small inputs: single full-extent block (no 8-alignment needed)

    grid = (pl.cdiv(R, tb),)

    out = pl.pallas_call(
        _scale_kernel,
        out_shape=jax.ShapeDtypeStruct((R, KDE), out_dtype),
        grid=grid,
        in_specs=[
            pl.BlockSpec((tb, KD), lambda i: (i, 0)),     # streamed batch tile of x
            pl.BlockSpec((KD, KDE), lambda i: (0, 0)),    # gm resident across grid
        ],
        out_specs=pl.BlockSpec((tb, KDE), lambda i: (i, 0)),
        compiler_params=pltpu.CompilerParams(
            dimension_semantics=("parallel",),            # shard batch across TCs (v7x)
        ),
        cost_estimate=pl.CostEstimate(
            flops=2 * R * KD * KDE,
            transcendentals=0,
            bytes_accessed=4 * (R * KDE + R * KD + KD * KDE),
        ),
    )(xf, gm)

    out = out.reshape(B_pad, DE)
    if B_pad != B:
        out = out[:B]
    return out


if __name__ == "__main__":
    key = jax.random.PRNGKey(0)
    k_w, k_x, k_w2, k_x3 = jax.random.split(key, 4)

    def reference(xv, weight, offsets):
        ge = weight[offsets]                                          # (D, E)
        return (xv.astype(jnp.float32)[:, :, None] * ge[None, :, :]).reshape(
            xv.shape[0], -1)

    # --- Config A: D*E = 64 < 128 -> exercises the row-packing (lane-dense) path.
    field_dims = (3, 4, 5, 6)          # D = 4 fields, vocab = 18
    embed_dim = 16
    D = len(field_dims)
    vocab = int(sum(field_dims))
    bound = float(np.sqrt(6.0 / (vocab + embed_dim)))   # xavier_uniform_
    weight = jax.random.uniform(
        k_w, (vocab, embed_dim), dtype=jnp.float32, minval=-bound, maxval=bound)
    offsets = jnp.asarray(
        np.array((0, *np.cumsum(field_dims)[:-1]), dtype=np.int32))

    # Case 1: small batch, auto tile size, packed output, 2-step grid.
    B1 = 32
    x1 = jax.random.randint(k_x, (B1, D), minval=0, maxval=min(field_dims),
                            dtype=jnp.int32)
    out1 = jax.block_until_ready(
        features_embedding_scale(x1, weight, offsets, embed_dim))
    assert out1.shape == (B1, D * embed_dim)
    np.testing.assert_allclose(np.asarray(out1),
                               np.asarray(reference(x1, weight, offsets)),
                               rtol=1e-6, atol=1e-6)

    # Case 2: explicit tb, non-divisible tail block (B=40 -> 20 packed rows, tb=16).
    B2 = 40
    x2 = jax.random.randint(jax.random.fold_in(k_x, 1), (B2, D),
                            minval=0, maxval=min(field_dims), dtype=jnp.int32)
    out2 = jax.block_until_ready(
        features_embedding_scale(x2, weight, offsets, embed_dim, tb=16))
    assert out2.shape == (B2, D * embed_dim)
    np.testing.assert_allclose(np.asarray(out2),
                               np.asarray(reference(x2, weight, offsets)),
                               rtol=1e-6, atol=1e-6)

    # --- Config B: D*E = 128 -> unpacked path (already lane-dense), padded K dim.
    embed_dim_b = 32
    bound_b = float(np.sqrt(6.0 / (vocab + embed_dim_b)))
    weight_b = jax.random.uniform(
        k_w2, (vocab, embed_dim_b), dtype=jnp.float32,
        minval=-bound_b, maxval=bound_b)
    B3 = 24
    x3 = jax.random.randint(k_x3, (B3, D), minval=0, maxval=min(field_dims),
                            dtype=jnp.int32)
    out3 = jax.block_until_ready(
        features_embedding_scale(x3, weight_b, offsets, embed_dim_b))
    assert out3.shape == (B3, D * embed_dim_b)
    np.testing.assert_allclose(np.asarray(out3),
                               np.asarray(reference(x3, weight_b, offsets)),
                               rtol=1e-6, atol=1e-6)

    print("KERNEL_OK")
</pallas_src>

<mosaic_0001>
module attributes {stable_mosaic.version = 11 : i64} {
  func.func @_scale_kernel(%arg0: i32, %arg1: memref<8x8xf32, #tpu.memory_space<vmem>>, %arg2: memref<8x128xf32, #tpu.memory_space<vmem>>, %arg3: memref<8x128xf32, #tpu.memory_space<vmem>>) attributes {dimension_semantics = [#tpu.dimension_semantics<parallel>], iteration_bounds = array<i64: 2>, scalar_prefetch = 0 : i64, scratch_operands = 0 : i64, tpu.core_type = #tpu.core_type<tc>, window_params = [{transform_indices = @transform_0, window_bounds = array<i64: 8, 8>}, {pipeline_mode = #tpu.pipeline_mode<synchronous>, transform_indices = @transform_1, window_bounds = array<i64: 8, 128>}, {transform_indices = @transform_2, window_bounds = array<i64: 8, 128>}]} {
    %c0 = arith.constant 0 : index
    %c0_0 = arith.constant 0 : index
    %0 = vector.load %arg1[%c0, %c0_0] : memref<8x8xf32, #tpu.memory_space<vmem>>, vector<8x8xf32>
    %c0_1 = arith.constant 0 : index
    %c0_2 = arith.constant 0 : index
    %1 = vector.load %arg2[%c0_1, %c0_2] : memref<8x128xf32, #tpu.memory_space<vmem>>, vector<8x128xf32>
    %cst = arith.constant dense<0.000000e+00> : vector<8x128xf32>
    %2 = tpu.matmul %0, %1, %cst {dimension_numbers = #tpu.dot_dimension_numbers<[1], [0], [0], [1], [0, 0, 1, 1], [], []>, precision = #tpu.contract_precision<fp32>} : vector<8x8xf32>, vector<8x128xf32>, vector<8x128xf32> -> vector<8x128xf32>
    %c0_3 = arith.constant 0 : index
    %c0_4 = arith.constant 0 : index
    %3 = vector.load %arg3[%c0_3, %c0_4] : memref<8x128xf32, #tpu.memory_space<vmem>>, vector<8x128xf32>
    tpu.vector_store %arg3[%c0_3, %c0_4], %2 {strides = array<i32>} : memref<8x128xf32, #tpu.memory_space<vmem>>, vector<8x128xf32>,
    return
  }
  func.func @transform_0(%arg0: i32) -> (i32, i32) {
    %c0_i32 = arith.constant 0 : i32
    %c0_i32_0 = arith.constant 0 : i32
    return %arg0, %c0_i32 : i32, i32
  }
  func.func @transform_1(%arg0: i32) -> (i32, i32) {
    %c0_i32 = arith.constant 0 : i32
    %c0_i32_0 = arith.constant 0 : i32
    %c0_i32_1 = arith.constant 0 : i32
    return %c0_i32, %c0_i32_0 : i32, i32
  }
  func.func @transform_2(%arg0: i32) -> (i32, i32) {
    %c0_i32 = arith.constant 0 : i32
    %c0_i32_0 = arith.constant 0 : i32
    return %arg0, %c0_i32 : i32, i32
  }
}

</mosaic_0001>

<bundles_post_ra>
// kernel: tpu_custom_call.1
= control target key start
LH: loop header
LB: loop body
LE: loop exit
PB: predicated region body
PF: predicated region fallthrough
CT: control target
= control target key end

     0   :  { %7 = vsyncpa [#allocation3], 0  ;;  %s958_s0 = inlined_call_operand.vmem [shape: f32[16,8], index: 0, kind: input, shape index: {}]   ;;  %s959_s1 = inlined_call_operand.vmem [shape: f32[8,128], index: 1, kind: input, shape index: {}]   ;;  %s960_s2 = inlined_call_operand.hbm [shape: f32[16,128], index: 2, kind: output, shape index: {}]  }
   0x1   :  { %9 = vsyncpa [#allocation3 + $0x1], 0  ;;  %s849_s9 = smov 0   ;;  %s851_s10 = smov 0  }
   0x2   :  { %s853_s11 = smov 0   ;;  %s855_s12 = smov 0  }
   0x3 LB: > { %s870_s13 = sadd.s32 4294967295, %s829_s12   ;;  %s665_s14 = sadd.s32 4294967294, %s829_s12   ;;  %s829_s12 = sphi %s855_s12, %s966_s12   ;;  %s825_s11 = sphi %s853_s11, %s965_s11   ;;  %s821_s10 = sphi %s851_s10, %s964_s10   ;;  %s817_s9 = sphi %s849_s9, %s963_s9  }
   0x4   : > { %s874_s15 = sadd.s32 1, %s829_s12   ;;  %s69_s16 = sadd.s32 1, %s825_s11 }
   0x5   : > { %s66_s17 = ssub.s32 %s829_s12, %s874_s15  ;;  %p79_p0 = scmp.ne.s32.totalorder %s825_s11, %s821_s10 }
   0x6   : > { %p67_p1 = scmp.eq.s32.totalorder %s66_s17, 0  ;;  %p80_p2 = scmp.eq.s32.totalorder %s870_s13, 1 }
   0x7   : > { %p85_p3 = scmp.ne.s32.totalorder %s821_s10, %s817_s9  ;;  %p86_p4 = scmp.eq.s32.totalorder %s665_s14, 1 }
   0x8   : > { %s885_s18 = scalar_select %p67_p1, %s825_s11, %s69_s16  }
   0x9   : > { %p887_p5 = por %p80_p2, %p79_p0  ;;  %p891_p6 = por %p86_p4, %p85_p3 }
   0xa   : > { %p668_p7 = scmp.ge.s32.totalorder %s829_s12, 1  ;;  %p114_p8 = scmp.lt.s32.totalorder %s829_s12, 3 }
   0xc   : > { %p115_p9 = pnand %p668_p7, %p114_p8 }
   0xd   : > { %v140_v0 = vld [vmem:[%s959_s1] sm:$0xff] (!%p115_p9)  ;;  %p135_p10 = scmp.lt.s32.totalorder (!%p115_p9), %s870_s13, 1  ;;  %v831_v1 = vmov (!%p115_p9), 0.0   ;;  %vm832_vm0 = vmmov (!%p115_p9), 0   ;;  %vm141_vm1 = vcmask (!%p115_p9), 64512   ;;  %s132_s28 = sand.u32 (!%p115_p9), 1, %s821_s10  }
   0xe   : > { %118 = sbr.rel (%p115_p9) target bundleno = 281 (0x119), region = 28  ;;  %702 = vmatprep.subr.mxu0 (!%p115_p9), %v831_v1  ;;  %v146_v2 = vand.u32 (!%p115_p9), 4294901760, %v140_v0  ;;  %704 = vmatprep.mubr.msk.f32.mxu0 (!%p115_p9), %vm832_vm0, %v831_v1  ;;  %s669_s29 = sshll.u32 (!%p115_p9), %s132_s28, 3 }
   0xf   : > { %687 = vmatprep.subr.mxu1 (!%p115_p9), %v831_v1  ;;  %689 = vmatprep.mubr.msk.f32.mxu1 (!%p115_p9), %vm832_vm0, %v831_v1  ;;  %s672_s30 = sshll.u32 (!%p115_p9), %s870_s13, 7  ;;  %s134_s3 = scalar_lea.vmem (!%p115_p9), [#allocation2], %s669_s29 }
  0x10   : > { %v223_v3 = vsub.f32 (!%p115_p9), %v140_v0, %v146_v2  ;;  %703 = vmatpush3.msra.mxu0 (!%p115_p9), %v146_v2  ;;  %688 = vmatpush3.msra.mxu1 (!%p115_p9), %v146_v2  ;;  %s606_s4 = sshll.u32 (!%p115_p9), %s134_s3, 4  ;;  %s916_s7 = scalar_lea.hbm (!%p115_p9), %s960_s2, %s672_s30  ;;  %s918_s4 = int_to_ptr.vmem [resolvable:$true] %s606_s4 }
  0x11   : > { %692 = vmatprep.subr.mxu1 (!%p115_p9), %v831_v1  ;;  %707 = vmatprep.subr.mxu0 (!%p115_p9), %v831_v1  ;;  %s593_s8 = scalar_lea.sflag (!%p115_p9), [#allocation3], %s132_s28  ;;  %s767_s14 = scalar_lea.vmem (!%p115_p9), %s918_s4, 128 }
  0x12   : > { %v224_v6 = vand.u32 (!%p115_p9), 4294901760, %v223_v3  ;;  %p768_p11 = scmp.ne.s32.totalorder (!%p115_p9), %s918_s4, %s767_s14 }
  0x14   : > { %v225_v9 = vsub.f32 (!%p115_p9), %v223_v3, %v224_v6  ;;  %p769_p12 = pnand (!%p115_p9), %p768_p11, %p887_p5 }
  0x15   : > { %s136_s23 = scalar_select %p135_p10, %s870_s13, 1 }
  0x16   : > { %v226_v12 = vand.u32 4294901760, %v225_v9  ;;  %p770_p13 = pneg %p769_p12  ;;  %s833_s13 = smov [#allocation2]  }
  0x17   : > { %s670_s24 = sshll.u32 %s136_s23, 3  ;;  %s771_s16 = sshll.u32 %s833_s13, 4  ;;  %s772_s16 = int_to_ptr.vmem [resolvable:$false] %s771_s16 }
  0x18   : > { %s138_s27 = scalar_lea.vmem %s958_s0, %s670_s24  ;;  %s773_s17 = scalar_lea.vmem %s772_s16, 256 }
  0x19   : > { %v139_v4 = vld [vmem:[%s138_s27] sm:$0xff]  ;;  %p774_p0 = scmp.lt.s32.totalorder %s918_s4, %s772_s16  ;;  %p775_p1 = scmp.lt.s32.totalorder %s773_s17, %s767_s14 }
  0x1a   : > { %v143_v5 = vsel %vm141_vm1, %v139_v4, 0 }
  0x1b   : > { %v211_v7 = vand.u32 4294901760, %v143_v5  ;;  %p776_p2 = por %p775_p1, %p774_p0 }
  0x1d   : > { %v212_v8 = vsub.f32 %v143_v5, %v211_v7  ;;  %p777_p3 = pnand %p776_p2, %p770_p13 }
  0x1f   : > { %v213_v10 = vand.u32 4294901760, %v212_v8 }
  0x21   : > { %705 = vmatmul.mubr.f32.vlgmr.msra.gmra.mrb[0].mxu0 %v213_v10  ;;  %v214_v11 = vsub.f32 %v212_v8, %v213_v10 }
  0x22   : > { %708 = vmatpush3.msra.mxu0 %v224_v6  ;;  %709 = vmatprep.mubr.msk.f32.mxu0 %vm832_vm0, %v831_v1 }
  0x23   : > { %v215_v13 = vand.u32 4294901760, %v214_v11  ;;  %712 = vmatprep.subr.mxu0 %v831_v1 }
  0x25   : > { %690 = vmatmul.mubr.f32.vlgmr.msra.gmra.mrb[0].mxu1 %v215_v13 }
  0x26   : > { %693 = vmatpush3.msra.mxu1 %v226_v12  ;;  %694 = vmatprep.mubr.msk.f32.mxu1 %vm832_vm0, %v831_v1 }
  0x27   : > { %697 = vmatprep.subr.mxu1 %v831_v1 }
  0x29   : > { %710 = vmatmul.mubr.f32.vlgmr.msra.gmra.mrb[0].mxu0 %v211_v7 }
  0x2a   : > { %713 = vmatpush3.msra.mxu0 %v146_v2  ;;  %714 = vmatprep.mubr.msk.f32.mxu0 %vm832_vm0, %v831_v1 }
  0x2d   : > { %695 = vmatmul.mubr.f32.vlgmr.msra.gmra.mrb[0].mxu1 %v211_v7 }
  0x2e   : > { %698 = vmatpush3.msra.mxu1 %v223_v3  ;;  %699 = vmatprep.mubr.msk.f32.mxu1 %vm832_vm0, %v831_v1 }
  0x31   : > { %715 = vmatmul.mubr.f32.vlgmr.msra.gmra.mrb[0].mxu0 %v211_v7 }
  0x35   : > { %700 = vmatmul.mubr.f32.vlgmr.msra.gmra.mrb[0].mxu1 %v212_v8 }
 0x104   : > { %v587_v14 = vpop.f32.mrb[0].mxu0 }
 0x105   : > { %v716_v15 = vpop.f32.mrb[1].mxu0 }
 0x108   : > { %v367_v16 = vpop.f32.mrb[0].mxu1 }
 0x109   : > { %v717_v17 = vadd.f32 %v587_v14, %v367_v16  ;;  %v701_v18 = vpop.f32.mrb[1].mxu1 }
 0x10b   : > { %591 = vst [vmem:[%s134_s3] sm:$0xff] %v717_v17 }
 0x10c   : > { %780 = shalt.err (!%p777_p3)
}
 0x10d   : > { %s781_s21 = scalar_lea.hbm %s916_s7, 128  ;;  %s785_s24 = scalar_lea.hbm %s960_s2, 256 }
 0x10e   : > { %p782_p4 = scmp.ne.s32.totalorder %s916_s7, %s781_s21  ;;  %p786_p9 = scmp.lt.u32.totalorder %s916_s7, %s960_s2 }
 0x10f   : > { %p787_p10 = scmp.lt.u32.totalorder %s785_s24, %s781_s21  ;;  %p789_p12 = scmp.lt.u32.totalorder %s781_s21, %s916_s7 }
 0x110   : > { %p783_p7 = pnand %p782_p4, %p887_p5 }
 0x111   : > { %p788_p11 = por %p787_p10, %p786_p9 }
 0x112   : > { %p784_p8 = pneg %p783_p7 }
 0x113   : > { %p790_p13 = por %p789_p12, %p788_p11 }
 0x115   : > { %p791_p0 = pnand %p790_p13, %p784_p8 }
 0x117   : > { %794 = shalt.err (!%p791_p0)
}
 0x118   : > { %726 = dma.vmem_to_hbm [thread:$0]  (%p887_p5), %s918_s4, 128, %s916_s7, %s593_s8  }
 0x119 PF: > { %p732_p1 = scmp.ge.s32.totalorder %s829_s12, 2  ;;  %s618_s27 = sand.u32 1, %s817_s9  }
 0x11a   : > { %s619_s28 = scalar_lea.sflag [#allocation3], %s618_s27 }
 0x11b   : > { %p729_p2 = pnand %p732_p1, %p891_p6 }
 0x11d   : > { %812 = dma.done.wait (!%p729_p2), %s619_s28, 128  }
 0x11e   : > { %814 = vsyncadd (!%p729_p2), %s619_s28, 4294967168  ;;  %p12_p3 = scmp.ge.s32.totalorder %s874_s15, 4   ;;  %s963_s9 = smov %s821_s10 }
 0x11f   : > { %s964_s10 = smov %s825_s11  ;;  %s965_s11 = smov %s885_s18 }
 0x120   : > { %s966_s12 = smov %s874_s15  ;;  %14 = sbr.rel (!%p12_p3) target bundleno = 3 (0x3), region = 63 }
 0x127   :  { %624 = vsyncpa [#allocation3], 1 }
 0x128   :  { %626 = vsyncpa [#allocation3 + $0x1], 1 }

</bundles_post_ra>
